<compile_context>
chip_gen: v7x
topology: tpu7x:2x2x1
jax: 0.10.0
libtpu: 0.0.40
codegen_flags: <defaults>
</compile_context>

<pallas_src>
import functools
import math

import jax
import jax.numpy as jnp
from jax.experimental import pallas as pl
from jax.experimental.pallas import tpu as pltpu

# Deterministic stand-in for IMAGE_ROTATE_DETECTOR_ANGLES (radians, as the
# original code feeds the values straight into cos/sin).
IMAGE_ROTATE_DETECTOR_ANGLES = {
    "CIFAR-10": [-math.pi / 6.0, 0.0, math.pi / 6.0],
}

# TODO(synk): random_rotate=True re-samples angles with host-side Python
# `random`; only the default (random_rotate=False) path is implemented here.
# TODO(synk): very large images (e.g. 224x224) additionally need an HW-output
# tiling grid axis (the (W, HW) column-weight matrix grows to ~45 MiB there);
# CIFAR-scale images fit comfortably as-is.


def _affine_grid_sample_kernel(theta_ref, xn_ref, yn_ref, x_ref, o_ref, *,
                               H, W, bc_tile):
    """One affine transform applied to a bc_tile-slab of (C,H,W) image planes.

    Equivalent to F.grid_sample(x, F.affine_grid(theta, size), mode='bilinear',
    padding_mode='zeros', align_corners=False) via a separable bilinear
    factorization (column matmul on the MXU + row blend on the VPU).
    """
    t = pl.program_id(0)
    t00 = theta_ref[t, 0]
    t01 = theta_ref[t, 1]
    t02 = theta_ref[t, 2]
    t10 = theta_ref[t, 3]
    t11 = theta_ref[t, 4]
    t12 = theta_ref[t, 5]

    HW = H * W
    xn = xn_ref[...]  # (1, HW) normalized x of the identity output grid
    yn = yn_ref[...]  # (1, HW) normalized y of the identity output grid

    # affine_grid: [gx, gy] = theta @ [x_n, y_n, 1]
    gx = t00 * xn + t01 * yn + t02
    gy = t10 * xn + t11 * yn + t12

    # unnormalize (align_corners=False)
    ix = ((gx + 1.0) * W - 1.0) * 0.5
    iy = ((gy + 1.0) * H - 1.0) * 0.5

    ix0f = jnp.floor(ix)
    iy0f = jnp.floor(iy)
    wx = ix - ix0f                       # (1, HW)
    wy = iy - iy0f                       # (1, HW)
    ix0 = ix0f.astype(jnp.int32)         # (1, HW)
    iy0 = iy0f.astype(jnp.int32)         # (1, HW)

    # Column-gather weights (W, HW): both x corners combined in one matrix.
    # Out-of-range corners never match any iota row -> zero padding for free.
    col_iota = jax.lax.broadcasted_iota(jnp.int32, (W, 1), 0)
    w_col = (jnp.where(col_iota == ix0, 1.0 - wx, 0.0)
             + jnp.where(col_iota == ix0 + 1, wx, 0.0))          # (W, HW)

    # Stage 1 (MXU): x-interp of all bc_tile*H input rows in one matmul.
    tmp = jnp.dot(x_ref[...], w_col,
                  preferred_element_type=jnp.float32)            # (bc*H, HW)

    # Row-blend weights (H, HW): both y corners combined.
    row_iota = jax.lax.broadcasted_iota(jnp.int32, (H, 1), 0)
    w_row = (jnp.where(row_iota == iy0, 1.0 - wy, 0.0)
             + jnp.where(row_iota == iy0 + 1, wy, 0.0))          # (H, HW)

    # Stage 2 (VPU/XLU): weighted reduction over the H source rows.
    # (Reshape is tile-aligned for the usual H % 8 == 0 image sizes.)
    tmp3 = tmp.reshape(bc_tile, H, HW)
    o_ref[...] = jnp.sum(tmp3 * w_row[None, :, :], axis=1)


def _pick_bc_tile(BC, H, HW, max_tmp_bytes=4 * 1024 * 1024):
    """Largest multiple-of-8 divisor of BC whose stage-1 temporary fits the cap."""
    for d in range(BC, 0, -1):
        if BC % d == 0 and d % 8 == 0 and d * H * HW * 4 <= max_tmp_bytes:
            return d
    return BC  # single tile: block shape equals the full dim (layout-legal)


def _grid_sample_pass(x_nchw, thetas):
    """Apply T affine grid_samples to B images. Returns (T*B, C, H, W)."""
    B, C, H, W = x_nchw.shape
    T = thetas.shape[0]
    HW = H * W
    BC = B * C
    x_rows = x_nchw.reshape(BC * H, W).astype(jnp.float32)

    # Per-transform 2x3 thetas, padded into an SMEM scalar table (T, 8).
    theta_smem = jnp.zeros((T, 8), jnp.float32).at[:, :6].set(
        thetas.reshape(T, 6).astype(jnp.float32))

    # Normalized identity grid (constants; align_corners=False convention).
    idx = jnp.arange(HW, dtype=jnp.int32)
    col = (idx % W).astype(jnp.float32)
    row = (idx // W).astype(jnp.float32)
    xn = ((2.0 * col + 1.0) / W - 1.0).reshape(1, HW)
    yn = ((2.0 * row + 1.0) / H - 1.0).reshape(1, HW)

    bc_tile = _pick_bc_tile(BC, H, HW)
    n_bc = BC // bc_tile

    kernel = functools.partial(_affine_grid_sample_kernel, H=H, W=W,
                               bc_tile=bc_tile)
    out = pl.pallas_call(
        kernel,
        out_shape=jax.ShapeDtypeStruct((T, BC, HW), jnp.float32),
        grid=(T, n_bc),
        in_specs=[
            pl.BlockSpec(memory_space=pltpu.MemorySpace.SMEM),      # thetas
            pl.BlockSpec((1, HW), lambda t, j: (0, 0)),             # xn
            pl.BlockSpec((1, HW), lambda t, j: (0, 0)),             # yn
            pl.BlockSpec((bc_tile * H, W), lambda t, j: (j, 0)),    # image rows
        ],
        out_specs=pl.BlockSpec((None, bc_tile, HW), lambda t, j: (t, j, 0)),
        compiler_params=pltpu.CompilerParams(
            dimension_semantics=("parallel", "parallel"),
            vmem_limit_bytes=32 * 1024 * 1024),
    )(theta_smem, xn, yn, x_rows)
    return out.reshape(T * B, C, H, W)


def _shift_thetas(shift_pixels_one_direction, H, W):
    # Same direction order / right-gets-extra-0 behavior as the module.
    dirs = ("up", "down", "left", "right")
    shifts = {d: list(shift_pixels_one_direction) for d in dirs}
    shifts["right"].append(0)
    rows = []
    for d in dirs:
        for s in shifts[d]:
            if d == "left":
                tx, ty = s, 0
            elif d == "right":
                tx, ty = -s, 0
            elif d == "up":
                tx, ty = 0, s
            else:  # down
                tx, ty = 0, -s
            rows.append([[1.0, 0.0, tx / float(W - 1)],
                         [0.0, 1.0, ty / float(H - 1)]])
    return jnp.asarray(rows, jnp.float32)


def _rotate_thetas(angles):
    rows = [[[math.cos(a), math.sin(a), 0.0],
             [-math.sin(a), math.cos(a), 0.0]] for a in angles]
    return jnp.asarray(rows, jnp.float32)


def image_transform_forward(x_nhwc, shift_pixels_one_direction, rotate_angles,
                            sample_pass=_grid_sample_pass):
    """JAX/Pallas equivalent of ImageTransformTorch.forward (random_rotate=False)."""
    B, H, W, C = x_nhwc.shape
    x_nchw = jnp.transpose(x_nhwc, (0, 3, 1, 2))            # NHWC -> NCHW
    # Two chained resamples (shift then rotate), exactly like the module.
    # (Composing the thetas into one pass would halve the work but change the
    #  double-resample numerics, so it is intentionally not done.)
    shifted = sample_pass(x_nchw,
                          _shift_thetas(shift_pixels_one_direction, H, W))
    rotated = sample_pass(shifted, _rotate_thetas(rotate_angles))
    out = jnp.transpose(rotated, (0, 2, 3, 1))              # -> NHWC
    return out.reshape(-1, B, H, W, C)


# ----------------------- pure-JAX reference (for checking) ------------------
def _grid_sample_pass_ref(x_nchw, thetas):
    B, C, H, W = x_nchw.shape
    T = thetas.shape[0]
    HW = H * W
    x_flat = x_nchw.reshape(B, C, HW).astype(jnp.float32)
    idx = jnp.arange(HW, dtype=jnp.int32)
    col = (idx % W).astype(jnp.float32)
    row = (idx // W).astype(jnp.float32)
    xn = (2.0 * col + 1.0) / W - 1.0
    yn = (2.0 * row + 1.0) / H - 1.0
    gx = thetas[:, 0, 0, None] * xn + thetas[:, 0, 1, None] * yn + thetas[:, 0, 2, None]
    gy = thetas[:, 1, 0, None] * xn + thetas[:, 1, 1, None] * yn + thetas[:, 1, 2, None]
    ix = ((gx + 1.0) * W - 1.0) * 0.5
    iy = ((gy + 1.0) * H - 1.0) * 0.5
    ix0 = jnp.floor(ix)
    iy0 = jnp.floor(iy)
    wx1 = ix - ix0
    wy1 = iy - iy0
    acc = jnp.zeros((T, B, C, HW), jnp.float32)
    for cy, cx, w in ((iy0, ix0, (1 - wy1) * (1 - wx1)),
                      (iy0, ix0 + 1, (1 - wy1) * wx1),
                      (iy0 + 1, ix0, wy1 * (1 - wx1)),
                      (iy0 + 1, ix0 + 1, wy1 * wx1)):
        valid = ((cx >= 0) & (cx <= W - 1) & (cy >= 0) & (cy <= H - 1)).astype(jnp.float32)
        src = (jnp.clip(cy, 0, H - 1) * W + jnp.clip(cx, 0, W - 1)).astype(jnp.int32)
        g = jnp.take(x_flat, src, axis=2)          # (B, C, T, HW)
        g = jnp.transpose(g, (2, 0, 1, 3))         # (T, B, C, HW)
        acc = acc + g * (w * valid)[:, None, None, :]
    return acc.reshape(T * B, C, H, W)


if __name__ == "__main__":
    key = jax.random.PRNGKey(0)
    B, H, W, C = 2, 16, 16, 4
    x = jax.random.uniform(key, (B, H, W, C), dtype=jnp.float32)

    shift_pixels = [1, 2]                          # -> 2+2+2+3 = 9 shift transforms
    angles = IMAGE_ROTATE_DETECTOR_ANGLES["CIFAR-10"]

    out = image_transform_forward(x, shift_pixels, angles)
    out = jax.block_until_ready(out)

    ref = image_transform_forward(x, shift_pixels, angles,
                                  sample_pass=_grid_sample_pass_ref)
    S = 4 * len(shift_pixels) + 1
    assert out.shape == (len(angles) * S, B, H, W, C), out.shape
    err = float(jnp.max(jnp.abs(out - ref)))
    assert err < 1e-4, f"max abs err {err}"
    print("KERNEL_OK")
</pallas_src>

<mosaic_0001>
module attributes {stable_mosaic.version = 11 : i64} {
  func.func @_affine_grid_sample_kernel(%arg0: i32, %arg1: i32, %arg2: memref<9x8xf32, #tpu.memory_space<smem>>, %arg3: memref<1x256xf32, #tpu.memory_space<vmem>>, %arg4: memref<1x256xf32, #tpu.memory_space<vmem>>, %arg5: memref<128x16xf32, #tpu.memory_space<vmem>>, %arg6: memref<1x8x256xf32, #tpu.memory_space<vmem>>) attributes {dimension_semantics = [#tpu.dimension_semantics<parallel>, #tpu.dimension_semantics<parallel>], iteration_bounds = array<i64: 9, 1>, scalar_prefetch = 0 : i64, scratch_operands = 0 : i64, tpu.core_type = #tpu.core_type<tc>, window_params = [{transform_indices = @transform_0, window_bounds = array<i64: 9, 8>}, {pipeline_mode = #tpu.pipeline_mode<synchronous>, transform_indices = @transform_1, window_bounds = array<i64: 1, 256>}, {pipeline_mode = #tpu.pipeline_mode<synchronous>, transform_indices = @transform_2, window_bounds = array<i64: 1, 256>}, {transform_indices = @transform_3, window_bounds = array<i64: 128, 16>}, {transform_indices = @transform_4, window_bounds = array<i64: 1, 8, 256>}]} {
    %0 = arith.index_cast %arg0 : i32 to index
    %c0 = arith.constant 0 : index
    %1 = memref.load %arg2[%0, %c0] : memref<9x8xf32, #tpu.memory_space<smem>>
    %2 = arith.index_cast %arg0 : i32 to index
    %c1 = arith.constant 1 : index
    %3 = memref.load %arg2[%2, %c1] : memref<9x8xf32, #tpu.memory_space<smem>>
    %4 = arith.index_cast %arg0 : i32 to index
    %c2 = arith.constant 2 : index
    %5 = memref.load %arg2[%4, %c2] : memref<9x8xf32, #tpu.memory_space<smem>>
    %6 = arith.index_cast %arg0 : i32 to index
    %c3 = arith.constant 3 : index
    %7 = memref.load %arg2[%6, %c3] : memref<9x8xf32, #tpu.memory_space<smem>>
    %8 = arith.index_cast %arg0 : i32 to index
    %c4 = arith.constant 4 : index
    %9 = memref.load %arg2[%8, %c4] : memref<9x8xf32, #tpu.memory_space<smem>>
    %10 = arith.index_cast %arg0 : i32 to index
    %c5 = arith.constant 5 : index
    %11 = memref.load %arg2[%10, %c5] : memref<9x8xf32, #tpu.memory_space<smem>>
    %c0_0 = arith.constant 0 : index
    %c0_1 = arith.constant 0 : index
    %12 = vector.load %arg3[%c0_0, %c0_1] : memref<1x256xf32, #tpu.memory_space<vmem>>, vector<1x256xf32>
    %c0_2 = arith.constant 0 : index
    %c0_3 = arith.constant 0 : index
    %13 = vector.load %arg4[%c0_2, %c0_3] : memref<1x256xf32, #tpu.memory_space<vmem>>, vector<1x256xf32>
    %14 = vector.broadcast %1 : f32 to vector<1x256xf32>
    %15 = arith.mulf %14, %12 : vector<1x256xf32>
    %16 = vector.broadcast %3 : f32 to vector<1x256xf32>
    %17 = arith.mulf %16, %13 : vector<1x256xf32>
    %18 = arith.addf %15, %17 : vector<1x256xf32>
    %19 = vector.broadcast %5 : f32 to vector<1x256xf32>
    %20 = arith.addf %18, %19 : vector<1x256xf32>
    %21 = vector.broadcast %7 : f32 to vector<1x256xf32>
    %22 = arith.mulf %21, %12 : vector<1x256xf32>
    %23 = vector.broadcast %9 : f32 to vector<1x256xf32>
    %24 = arith.mulf %23, %13 : vector<1x256xf32>
    %25 = arith.addf %22, %24 : vector<1x256xf32>
    %26 = vector.broadcast %11 : f32 to vector<1x256xf32>
    %27 = arith.addf %25, %26 : vector<1x256xf32>
    %cst = arith.constant 1.000000e+00 : f32
    %28 = vector.broadcast %cst : f32 to vector<1x256xf32>
    %29 = arith.addf %20, %28 : vector<1x256xf32>
    %cst_4 = arith.constant 1.600000e+01 : f32
    %30 = vector.broadcast %cst_4 : f32 to vector<1x256xf32>
    %31 = arith.mulf %29, %30 : vector<1x256xf32>
    %cst_5 = arith.constant 1.000000e+00 : f32
    %32 = vector.broadcast %cst_5 : f32 to vector<1x256xf32>
    %33 = arith.subf %31, %32 : vector<1x256xf32>
    %cst_6 = arith.constant 5.000000e-01 : f32
    %34 = vector.broadcast %cst_6 : f32 to vector<1x256xf32>
    %35 = arith.mulf %33, %34 : vector<1x256xf32>
    %cst_7 = arith.constant 1.000000e+00 : f32
    %36 = vector.broadcast %cst_7 : f32 to vector<1x256xf32>
    %37 = arith.addf %27, %36 : vector<1x256xf32>
    %cst_8 = arith.constant 1.600000e+01 : f32
    %38 = vector.broadcast %cst_8 : f32 to vector<1x256xf32>
    %39 = arith.mulf %37, %38 : vector<1x256xf32>
    %cst_9 = arith.constant 1.000000e+00 : f32
    %40 = vector.broadcast %cst_9 : f32 to vector<1x256xf32>
    %41 = arith.subf %39, %40 : vector<1x256xf32>
    %cst_10 = arith.constant 5.000000e-01 : f32
    %42 = vector.broadcast %cst_10 : f32 to vector<1x256xf32>
    %43 = arith.mulf %41, %42 : vector<1x256xf32>
    %44 = math.floor %35 : vector<1x256xf32>
    %45 = math.floor %43 : vector<1x256xf32>
    %46 = arith.subf %35, %44 : vector<1x256xf32>
    %47 = arith.subf %43, %45 : vector<1x256xf32>
    %48 = arith.fptosi %44 : vector<1x256xf32> to vector<1x256xi32>
    %49 = arith.fptosi %45 : vector<1x256xf32> to vector<1x256xi32>
    %50 = tpu.iota {dimensions = array<i32: 0>} : vector<16x1xi32>
    %51 = vector.broadcast %50 : vector<16x1xi32> to vector<16x256xi32>
    %52 = vector.broadcast %48 : vector<1x256xi32> to vector<16x256xi32>
    %53 = arith.cmpi eq, %51, %52 : vector<16x256xi32>
    %cst_11 = arith.constant 1.000000e+00 : f32
    %54 = vector.broadcast %cst_11 : f32 to vector<1x256xf32>
    %55 = arith.subf %54, %46 : vector<1x256xf32>
    %cst_12 = arith.constant 0.000000e+00 : f32
    %56 = vector.shape_cast %55 : vector<1x256xf32> to vector<1x256xf32>
    %57 = vector.broadcast %56 : vector<1x256xf32> to vector<16x256xf32>
    %58 = vector.broadcast %cst_12 : f32 to vector<16x256xf32>
    %59 = arith.select %53, %57, %58 : vector<16x256xi1>, vector<16x256xf32>
    %c1_i32 = arith.constant 1 : i32
    %60 = vector.broadcast %c1_i32 : i32 to vector<1x256xi32>
    %61 = arith.addi %48, %60 : vector<1x256xi32>
    %62 = vector.broadcast %50 : vector<16x1xi32> to vector<16x256xi32>
    %63 = vector.broadcast %61 : vector<1x256xi32> to vector<16x256xi32>
    %64 = arith.cmpi eq, %62, %63 : vector<16x256xi32>
    %cst_13 = arith.constant 0.000000e+00 : f32
    %65 = vector.shape_cast %46 : vector<1x256xf32> to vector<1x256xf32>
    %66 = vector.broadcast %65 : vector<1x256xf32> to vector<16x256xf32>
    %67 = vector.broadcast %cst_13 : f32 to vector<16x256xf32>
    %68 = arith.select %64, %66, %67 : vector<16x256xi1>, vector<16x256xf32>
    %69 = arith.addf %59, %68 : vector<16x256xf32>
    %c0_14 = arith.constant 0 : index
    %c0_15 = arith.constant 0 : index
    %70 = vector.load %arg5[%c0_14, %c0_15] : memref<128x16xf32, #tpu.memory_space<vmem>>, vector<128x16xf32>
    %cst_16 = arith.constant dense<0.000000e+00> : vector<128x256xf32>
    %71 = tpu.matmul %70, %69, %cst_16 {dimension_numbers = #tpu.dot_dimension_numbers<[1], [0], [0], [1], [0, 0, 1, 1], [], []>} : vector<128x16xf32>, vector<16x256xf32>, vector<128x256xf32> -> vector<128x256xf32>
    %72 = tpu.iota {dimensions = array<i32: 0>} : vector<16x1xi32>
    %73 = vector.broadcast %72 : vector<16x1xi32> to vector<16x256xi32>
    %74 = vector.broadcast %49 : vector<1x256xi32> to vector<16x256xi32>
    %75 = arith.cmpi eq, %73, %74 : vector<16x256xi32>
    %cst_17 = arith.constant 1.000000e+00 : f32
    %76 = vector.broadcast %cst_17 : f32 to vector<1x256xf32>
    %77 = arith.subf %76, %47 : vector<1x256xf32>
    %cst_18 = arith.constant 0.000000e+00 : f32
    %78 = vector.shape_cast %77 : vector<1x256xf32> to vector<1x256xf32>
    %79 = vector.broadcast %78 : vector<1x256xf32> to vector<16x256xf32>
    %80 = vector.broadcast %cst_18 : f32 to vector<16x256xf32>
    %81 = arith.select %75, %79, %80 : vector<16x256xi1>, vector<16x256xf32>
    %c1_i32_19 = arith.constant 1 : i32
    %82 = vector.broadcast %c1_i32_19 : i32 to vector<1x256xi32>
    %83 = arith.addi %49, %82 : vector<1x256xi32>
    %84 = vector.broadcast %72 : vector<16x1xi32> to vector<16x256xi32>
    %85 = vector.broadcast %83 : vector<1x256xi32> to vector<16x256xi32>
    %86 = arith.cmpi eq, %84, %85 : vector<16x256xi32>
    %cst_20 = arith.constant 0.000000e+00 : f32
    %87 = vector.shape_cast %47 : vector<1x256xf32> to vector<1x256xf32>
    %88 = vector.broadcast %87 : vector<1x256xf32> to vector<16x256xf32>
    %89 = vector.broadcast %cst_20 : f32 to vector<16x256xf32>
    %90 = arith.select %86, %88, %89 : vector<16x256xi1>, vector<16x256xf32>
    %91 = arith.addf %81, %90 : vector<16x256xf32>
    %92 = vector.shape_cast %71 : vector<128x256xf32> to vector<8x16x256xf32>
    %93 = vector.shape_cast %91 : vector<16x256xf32> to vector<1x16x256xf32>
    %94 = vector.broadcast %93 : vector<1x16x256xf32> to vector<8x16x256xf32>
    %95 = arith.mulf %92, %94 : vector<8x16x256xf32>
    %cst_21 = arith.constant dense<0.000000e+00> : vector<8x256xf32>
    %96 = vector.multi_reduction <add>, %95, %cst_21 [1] : vector<8x16x256xf32> to vector<8x256xf32>
    %c0_22 = arith.constant 0 : index
    %c0_23 = arith.constant 0 : index
    %c0_24 = arith.constant 0 : index
    %97 = vector.load %arg6[%c0_22, %c0_23, %c0_24] : memref<1x8x256xf32, #tpu.memory_space<vmem>>, vector<1x8x256xf32>
    %98 = vector.shape_cast %97 : vector<1x8x256xf32> to vector<8x256xf32>
    %99 = vector.shape_cast %96 : vector<8x256xf32> to vector<1x8x256xf32>
    tpu.vector_store %arg6[%c0_22, %c0_23, %c0_24], %99 {strides = array<i32>} : memref<1x8x256xf32, #tpu.memory_space<vmem>>, vector<1x8x256xf32>,
    return
  }
  func.func @transform_0(%arg0: i32, %arg1: i32) -> (i32, i32) {
    %c0_i32 = arith.constant 0 : i32
    %c0_i32_0 = arith.constant 0 : i32
    %c0_i32_1 = arith.constant 0 : i32
    return %c0_i32, %c0_i32_0 : i32, i32
  }
  func.func @transform_1(%arg0: i32, %arg1: i32) -> (i32, i32) {
    %c0_i32 = arith.constant 0 : i32
    %c0_i32_0 = arith.constant 0 : i32
    %c0_i32_1 = arith.constant 0 : i32
    return %c0_i32, %c0_i32_0 : i32, i32
  }
  func.func @transform_2(%arg0: i32, %arg1: i32) -> (i32, i32) {
    %c0_i32 = arith.constant 0 : i32
    %c0_i32_0 = arith.constant 0 : i32
    %c0_i32_1 = arith.constant 0 : i32
    return %c0_i32, %c0_i32_0 : i32, i32
  }
  func.func @transform_3(%arg0: i32, %arg1: i32) -> (i32, i32) {
    %c0_i32 = arith.constant 0 : i32
    %c0_i32_0 = arith.constant 0 : i32
    return %arg1, %c0_i32 : i32, i32
  }
  func.func @transform_4(%arg0: i32, %arg1: i32) -> (i32, i32, i32) {
    %c0_i32 = arith.constant 0 : i32
    %c0_i32_0 = arith.constant 0 : i32
    return %arg0, %arg1, %c0_i32 : i32, i32, i32
  }
}

</mosaic_0001>

<bundles_post_ra>
// kernel: tpu_custom_call.1
= control target key start
LH: loop header
LB: loop body
LE: loop exit
PB: predicated region body
PF: predicated region fallthrough
CT: control target
= control target key end

     0   :  { %9 = vsyncpa [#allocation4], 0  ;;  %s1492_s0 = inlined_call_operand.vmem [shape: f32[9,8], index: 0, kind: input, shape index: {}]   ;;  %s1493_s1 = inlined_call_operand.vmem [shape: f32[1,256], index: 1, kind: input, shape index: {}]   ;;  %s1494_s2 = inlined_call_operand.vmem [shape: f32[1,256], index: 2, kind: input, shape index: {}]   ;;  %s1495_s3 = inlined_call_operand.vmem [shape: f32[128,16], index: 3, kind: input, shape index: {}]   ;;  %s1496_s4 = inlined_call_operand.hbm [shape: f32[9,8,256], index: 4, kind: output, shape index: {}]  }
   0x1   :  { %10 = vsyncpa [#allocation3], 0 }
   0x2   :  { %12 = vsyncpa [#allocation3 + $0x1], 0  ;;  %s1147_s15 = smov 0   ;;  %s1149_s16 = smov 0  }
   0x3   :  { %s1151_s17 = smov 0   ;;  %s1153_s18 = smov 0  }
   0x4   :  { %s1155_s19 = smov 0   ;;  %s1157_s20 = smov 0  }
   0x5 LB: > { %s906_s21 = sadd.s32 4294967295, %s1115_s20   ;;  %s907_s22 = sadd.s32 4294967294, %s1115_s20   ;;  %s1115_s20 = sphi %s1157_s20, %s18_s20   ;;  %s1111_s19 = sphi %s1155_s19, %s1506_s19   ;;  %s1107_s18 = sphi %s1153_s18, %s1505_s18   ;;  %s1103_s17 = sphi %s1151_s17, %s1504_s17   ;;  %s1099_s16 = sphi %s1149_s16, %s1503_s16   ;;  %s1095_s15 = sphi %s1147_s15, %s1502_s15  }
   0x6   : > { %s30_s23 = sadd.s32 1, %s1111_s19  ;;  %s128_s24 = sadd.s32 1, %s1103_s17 }
   0x7   : > { %p32_p0 = scmp.ge.s32.totalorder %s30_s23, 9  ;;  %p138_p1 = scmp.ne.s32.totalorder %s1103_s17, %s1099_s16 }
   0x8   : > { %p139_p2 = scmp.eq.s32.totalorder %s906_s21, 8  ;;  %p144_p3 = scmp.ne.s32.totalorder %s1099_s16, %s1095_s15 }
   0x9   : > { %s1508_s23 = smov (%p32_p0, %s30_s23), 0  ;;  %p145_p5 = scmp.eq.s32.totalorder %s907_s22, 8 }
   0xa   : > { %p1187_p4 = por %p139_p2, %p138_p1  ;;  %s123_s26 = ssub.s32 %s1111_s19, %s1508_s23 }
   0xb   : > { %p908_p6 = scmp.ge.s32.totalorder %s1115_s20, 1  ;;  %p126_p7 = scmp.eq.s32.totalorder %s123_s26, 0 }
   0xc   : > { %p1194_p8 = por %p145_p5, %p144_p3  ;;  %p152_p9 = scmp.lt.s32.totalorder %s1115_s20, 10 }
   0xd   : > { %s1200_s28 = scalar_select %p126_p7, %s1103_s17, %s128_s24  }
   0xe   : > { %p1202_p10 = pnand %p908_p6, %p152_p9  ;;  %p1206_p11 = scmp.eq.s32.totalorder %s906_s21, 0 }
   0xf   : > { %s164_s7 = sshll.u32 %s1492_s0, 4  ;;  %s165_s7 = int_to_ptr.vmem [resolvable:$true] %s164_s7 }
  0x10   : > { %p955_p12 = pneg %p1202_p10  ;;  %s1018_s9 = scalar_lea.vmem %s165_s7, 256 }
  0x11   : > { %p1019_p0 = scmp.ne.s32.totalorder %s165_s7, %s1018_s9  ;;  %p1026_p5 = scmp.lt.s32.totalorder %s165_s7, %s165_s7 }
  0x12   : > { %p1217_p13 = pnand %p1206_p11, %p955_p12  ;;  %p1027_p6 = scmp.lt.s32.totalorder %s1018_s9, %s1018_s9 }
  0x14   : > { %p1020_p1 = pneg %p1217_p13  ;;  %p1028_p7 = por %p1027_p6, %p1026_p5 }
  0x16   : > { %p1021_p2 = pnand %p1020_p1, %p1019_p0 }
  0x18   : > { %p1022_p3 = pneg %p1021_p2 }
  0x1a   : > { %p1029_p9 = pnand %p1028_p7, %p1022_p3 }
  0x1c   : > { %1032 = shalt.err (!%p1029_p9)
}
  0x1d   : > { %s1117_s10 = smov [#allocation2]   ;;  %s1118_s11 = smov 128  }
  0x1e   : > { %s1119_s12 = smov 8   ;;  %195 = sbr.rel (%p1202_p10) target bundleno = 359 (0x167), region = 36 }
  0x1f   : > { %958 = dma.vmem_to_smem (!%p1217_p13), %s165_s7, 256, %s1117_s10, [#allocation4], %s1118_s11, %s1118_s11, %s1119_s12  }
  0x25   : > { %1086 = dma.done.wait (%p1206_p11), [#allocation4], 256  }
  0x26   : > { %1088 = vsyncadd (%p1206_p11), [#allocation4], 4294967040 }
  0x27   : > { %201 = sfence }
  0x28   : > { %s914_s13 = sshll.u32 %s1107_s18, 7  ;;  %v1120_v0 = vmov 0.0   ;;  %v240_v1 = vld [vmem:[%s1493_s1] sm:$0x3]  ;;  %v270_v19 = vlaneseq  ;;  %vm349_vm8 = vcmask 130048   ;;  %v334_v56 = vld [vmem:[%s1495_s3 + $0x8] sm:$0xff] }
  0x29   : > { %s229_s14 = sld [smem:[#allocation2 + %s914_s13]]  ;;  %s230_s21 = sadd.s32 1, %s914_s13  ;;  %462 = vmatprep.mubr.f32.mxu0 %v1120_v0  ;;  %510 = vmatprep.mubr.f32.mxu1 %v1120_v0  ;;  %v241_v2 = vld [vmem:[%s1494_s2] sm:$0x3]  ;;  %v342_v57 = vld [vmem:[%s1495_s3 + $0x48] sm:$0xff]  ;;  %v335_v58 = vld [vmem:[%s1495_s3 + $0x10] sm:$0xff] }
  0x2a   : > { %s231_s22 = sld [smem:[#allocation2 + %s230_s21]]  ;;  %s232_s24 = sadd.s32 2, %s914_s13  ;;  %v1242_v22 = vshrl.u32 %v270_v19, 7  ;;  %v333_v54 = vld [vmem:[%s1495_s3] sm:$0xff]  ;;  %v343_v59 = vld [vmem:[%s1495_s3 + $0x50] sm:$0xff]  ;;  %v336_v60 = vld [vmem:[%s1495_s3 + $0x18] sm:$0xff] }
  0x2b   : > { %s233_s26 = sld [smem:[#allocation2 + %s232_s24]]  ;;  %s234_s29 = sadd.s32 3, %s914_s13  ;;  %v341_v55 = vld [vmem:[%s1495_s3 + $0x40] sm:$0xff]  ;;  %v344_v61 = vld [vmem:[%s1495_s3 + $0x58] sm:$0xff] }
  0x2c   : > { %s235_s5 = sld [smem:[#allocation2 + %s234_s29]]  ;;  %s236_s6 = sadd.s32 4, %s914_s13  ;;  %v1245_v26 = vsub.s32 1, %v1242_v22  ;;  %v1248_v27 = vsub.s32 0, %v1242_v22  ;;  %v1251_v29 = vadd.s32 8, %v1242_v22  ;;  %v337_v62 = vld [vmem:[%s1495_s3 + $0x20] sm:$0xff] }
  0x2d   : > { %s237_s7 = sld [smem:[#allocation2 + %s236_s6]]  ;;  %s238_s8 = sadd.s32 5, %s914_s13  ;;  %v345_v63 = vld [vmem:[%s1495_s3 + $0x60] sm:$0xff] }
  0x2e   : > { %s239_s10 = sld [smem:[#allocation2 + %s238_s8]]  ;;  %s219_s13 = sand.u32 1, %s1099_s16  }
  0x2f   : > { %v242_v3 = vstv %s229_s14  ;;  %s913_s14 = sshll.u32 %s219_s13, 4  ;;  %s938_s21 = sshll.u32 %s1107_s18, 8 }
  0x30   : > { %v243_v4 = vmul.f32 %v242_v3, %v240_v1  ;;  %v244_v5 = vstv %s231_s22  ;;  %v339_v3 = vld [vmem:[%s1495_s3 + $0x30] sm:$0xff]  ;;  %s221_s22 = scalar_lea.vmem [#allocation5], %s913_s14  ;;  %s1442_s29 = scalar_lea.hbm %s1496_s4, %s938_s21 }
  0x31   : > { %v245_v6 = vmul.f32 %v244_v5, %v241_v2  ;;  %v247_v7 = vstv %s233_s26  ;;  %v340_v5 = vld [vmem:[%s1495_s3 + $0x38] sm:$0xff]  ;;  %s821_s24 = sshll.u32 %s221_s22, 4  ;;  %s1444_s24 = int_to_ptr.vmem [resolvable:$true] %s821_s24 }
  0x32   : > { %v249_v8 = vstv %s235_s5  ;;  %s805_s5 = scalar_lea.sflag [#allocation3], %s219_s13  ;;  %s1033_s6 = scalar_lea.vmem %s1444_s24, 256 }
  0x33   : > { %v246_v9 = vadd.f32 %v245_v6, %v243_v4  ;;  %v250_v10 = vmul.f32 %v249_v8, %v240_v1  ;;  %v251_v11 = vstv %s237_s7  ;;  %v338_v1 = vld [vmem:[%s1495_s3 + $0x28] sm:$0xff]  ;;  %v347_v4 = vld [vmem:[%s1495_s3 + $0x70] sm:$0xff]  ;;  %v348_v6 = vld [vmem:[%s1495_s3 + $0x78] sm:$0xff]  ;;  %p1034_p10 = scmp.ne.s32.totalorder %s1444_s24, %s1033_s6  ;;  %s1121_s7 = smov [#allocation5]  }
  0x34   : > { %v252_v12 = vmul.f32 %v251_v11, %v241_v2  ;;  %v254_v14 = vstv %s239_s10  ;;  %v346_v2 = vld [vmem:[%s1495_s3 + $0x68] sm:$0xff]  ;;  %s1037_s8 = sshll.u32 %s1121_s7, 4  ;;  %s1038_s8 = int_to_ptr.vmem [resolvable:$false] %s1037_s8 }
  0x35   : > { %v248_v13 = vadd.f32 %v247_v7, %v246_v9  ;;  %p1035_p11 = pnand %p1034_p10, %p1187_p4  ;;  %s1039_s30 = scalar_lea.vmem %s1038_s8, 512 }
  0x36   : > { %v253_v15 = vadd.f32 %v252_v12, %v250_v10  ;;  %p1040_p13 = scmp.lt.s32.totalorder %s1444_s24, %s1038_s8  ;;  %p1041_p0 = scmp.lt.s32.totalorder %s1039_s30, %s1033_s6 }
  0x37   : > { %v256_v16 = vadd.f32 1.0, %v248_v13  ;;  %p1036_p12 = pneg %p1035_p11 }
  0x38   : > { %v1240_v17 = vadd.f32 %v254_v14, %v253_v15  ;;  %p1042_p1 = por %p1041_p0, %p1040_p13 }
  0x39   : > { %v257_v18 = vmul.f32 16.0, %v256_v16 }
  0x3a   : > { %v260_v7 = vadd.f32 1.0, %v1240_v17  ;;  %p1043_p2 = pnand %p1042_p1, %p1036_p12 }
  0x3b   : > { %v915_v20 = vadd.f32 -1.0, %v257_v18 }
  0x3c   : > { %v261_v8 = vmul.f32 16.0, %v260_v7 }
  0x3d   : > { %v259_v21 = vmul.f32 0.5, %v915_v20 }
  0x3e   : > { %v916_v9 = vadd.f32 -1.0, %v261_v8 }
  0x3f   : > { %v264_v23 = vfloor.f32 %v259_v21 }
  0x40   : > { %v263_v10 = vmul.f32 0.5, %v916_v9 }
  0x41   : > { %v266_v24 = vsub.f32 %v259_v21, %v264_v23  ;;  %v945_v25 = vtrunc.f32 %v264_v23 }
  0x42   : > { %v265_v11 = vfloor.f32 %v263_v10 }
  0x43   : > { %v946_v28 = vcvt.f32.s32 %v945_v25  ;;  %v285_v30 = vsub.f32 1.0, %v266_v24  ;;  %v322_v35 = vrot.slane %v266_v24, %v1245_v26  ;;  %v318_v40 = vrot.slane %v266_v24, %v1248_v27 }
  0x44   : > { %v947_v12 = vtrunc.f32 %v265_v11  ;;  %v267_v13 = vsub.f32 %v263_v10, %v265_v11 }
  0x45   : > { %v280_v31 = vrot.slane %v946_v28, %v1245_v26  ;;  %v294_v32 = vrot.slane %v285_v30, %v1245_v26  ;;  %v301_v33 = vadd.s32 1, %v946_v28  ;;  %v276_v34 = vrot.slane %v946_v28, %v1248_v27 }
  0x46   : > { %v290_v36 = vrot.slane %v285_v30, %v1248_v27  ;;  %v571_v15 = vsub.f32 1.0, %v267_v13  ;;  %v604_v17 = vrot.slane %v267_v13, %v1248_v27  ;;  %v608_v24 = vrot.slane %v267_v13, %v1245_v26 }
  0x47   : > { %vm282_vm0 = vcmp.eq.s32.totalorder %v1242_v22, %v280_v31  ;;  %vm284_vm1 = vcmp.eq.s32.totalorder %v1251_v29, %v280_v31  ;;  %v309_v37 = vrot.slane %v301_v33, %v1245_v26  ;;  %vm281_vm2 = vcmp.eq.s32.totalorder %v1242_v22, %v276_v34 }
  0x48   : > { %v298_v38 = vsel %vm282_vm0, %v294_v32, 0.0  ;;  %v300_v39 = vsel %vm284_vm1, %v294_v32, 0.0  ;;  %vm283_vm3 = vcmp.eq.s32.totalorder %v1251_v29, %v276_v34  ;;  %v305_v41 = vrot.slane %v301_v33, %v1248_v27 }
  0x49   : > { %vm311_vm4 = vcmp.eq.s32.totalorder %v1242_v22, %v309_v37  ;;  %vm313_vm5 = vcmp.eq.s32.totalorder %v1251_v29, %v309_v37  ;;  %v297_v44 = vsel %vm281_vm2, %v290_v36, 0.0  ;;  %v299_v45 = vsel %vm283_vm3, %v290_v36, 0.0 }
  0x4a   : > { %v326_v42 = vsel %vm311_vm4, %v322_v35, 0.0  ;;  %v328_v43 = vsel %vm313_vm5, %v322_v35, 0.0  ;;  %vm310_vm6 = vcmp.eq.s32.totalorder %v1242_v22, %v305_v41  ;;  %vm312_vm7 = vcmp.eq.s32.totalorder %v1251_v29, %v305_v41 }
  0x4b   : > { %v330_v46 = vadd.f32 %v326_v42, %v298_v38  ;;  %v332_v47 = vadd.f32 %v328_v43, %v300_v39  ;;  %v325_v48 = vsel %vm310_vm6, %v318_v40, 0.0  ;;  %v327_v49 = vsel %vm312_vm7, %v318_v40, 0.0 }
  0x4c   : > { %v329_v51 = vadd.f32 %v325_v48, %v297_v44  ;;  %v331_v52 = vadd.f32 %v327_v49, %v299_v45  ;;  %v576_v21 = vrot.slane %v571_v15, %v1248_v27  ;;  %v580_v23 = vrot.slane %v571_v15, %v1245_v26 }
  0x4d   : > { %v939_v50 = vpack.c.bf16 %v332_v47, %v330_v46  ;;  %vm779_vm1 = vcmask 1041409   ;;  %vm781_vm2 = vcmask 1042434   ;;  %vm783_vm3 = vcmask 1043459  }
  0x4e   : > { %v941_v53 = vpack.c.bf16 %v331_v52, %v329_v51  ;;  %vm785_vm4 = vcmask 1044484   ;;  %vm787_vm5 = vcmask 1045509   ;;  %vm789_vm6 = vcmask 1046534  }
  0x4f   : > { %940 = vmatprep.subr.bf16.mxu0 %v939_v50  ;;  %943 = vmatprep.subr.bf16.mxu1 %v939_v50  ;;  %vm791_vm7 = vcmask 1047559  }
  0x50   : > { %942 = vmatpush1.bf16.msra.mxu0 %v941_v53  ;;  %944 = vmatpush1.bf16.msra.mxu1 %v941_v53 }
  0x53   : > { %917 = vmatmul.mubr.msk.f32.vlgmr.msra.gmra.mrb[0].mxu0 %vm349_vm8, %v333_v54  ;;  %925 = vmatmul.mubr.msk.f32.vlgmr.msra.gmra.mrb[0].mxu1 %vm349_vm8, %v341_v55 }
  0x54   : > { %468 = vmatprep.mubr.f32.mxu0 %v1120_v0  ;;  %516 = vmatprep.mubr.f32.mxu1 %v1120_v0 }
  0x57   : > { %918 = vmatmul.mubr.msk.f32.gmra.mrb[2].mxu0 %vm349_vm8, %v334_v56  ;;  %926 = vmatmul.mubr.msk.f32.gmra.mrb[2].mxu1 %vm349_vm8, %v342_v57 }
  0x58   : > { %474 = vmatprep.mubr.f32.mxu0 %v1120_v0  ;;  %522 = vmatprep.mubr.f32.mxu1 %v1120_v0 }
  0x5b   : > { %919 = vmatmul.mubr.msk.f32.gmra.mrb[4].mxu0 %vm349_vm8, %v335_v58  ;;  %927 = vmatmul.mubr.msk.f32.gmra.mrb[4].mxu1 %vm349_vm8, %v343_v59 }
  0x5c   : > { %480 = vmatprep.mubr.f32.mxu0 %v1120_v0  ;;  %528 = vmatprep.mubr.f32.mxu1 %v1120_v0 }
  0x5f   : > { %920 = vmatmul.mubr.msk.f32.gmra.mrb[6].mxu0 %vm349_vm8, %v336_v60  ;;  %928 = vmatmul.mubr.msk.f32.gmra.mrb[6].mxu1 %vm349_vm8, %v344_v61 }
  0x60   : > { %486 = vmatprep.mubr.f32.mxu0 %v1120_v0  ;;  %534 = vmatprep.mubr.f32.mxu1 %v1120_v0 }
  0x63   : > { %921 = vmatmul.mubr.msk.f32.gmra.mrb[8].mxu0 %vm349_vm8, %v337_v62  ;;  %929 = vmatmul.mubr.msk.f32.gmra.mrb[8].mxu1 %vm349_vm8, %v345_v63 }
  0x64   : > { %492 = vmatprep.mubr.f32.mxu0 %v1120_v0  ;;  %540 = vmatprep.mubr.f32.mxu1 %v1120_v0 }
  0x67   : > { %922 = vmatmul.mubr.msk.f32.gmra.mrb[10].mxu0 %vm349_vm8, %v338_v1  ;;  %930 = vmatmul.mubr.msk.f32.gmra.mrb[10].mxu1 %vm349_vm8, %v346_v2 }
  0x68   : > { %498 = vmatprep.mubr.f32.mxu0 %v1120_v0  ;;  %546 = vmatprep.mubr.f32.mxu1 %v1120_v0 }
  0x6b   : > { %923 = vmatmul.mubr.msk.f32.gmra.mrb[12].mxu0 %vm349_vm8, %v339_v3  ;;  %931 = vmatmul.mubr.msk.f32.gmra.mrb[12].mxu1 %vm349_vm8, %v347_v4 }
  0x6c   : > { %504 = vmatprep.mubr.f32.mxu0 %v1120_v0  ;;  %552 = vmatprep.mubr.f32.mxu1 %v1120_v0  ;;  %v948_v0 = vcvt.f32.s32 %v947_v12 }
  0x6e   : > { %v587_v14 = vadd.s32 1, %v948_v0  ;;  %v562_v16 = vrot.slane %v948_v0, %v1248_v27  ;;  %v566_v19 = vrot.slane %v948_v0, %v1245_v26 }
  0x6f   : > { %924 = vmatmul.mubr.msk.f32.gmra.mrb[14].mxu0 %vm349_vm8, %v340_v5  ;;  %932 = vmatmul.mubr.msk.f32.gmra.mrb[14].mxu1 %vm349_vm8, %v348_v6 }
  0x70   : > { %v591_v18 = vrot.slane %v587_v14, %v1248_v27  ;;  %v595_v20 = vrot.slane %v587_v14, %v1245_v26  ;;  %vm567_vm9 = vcmp.eq.s32.totalorder %v1242_v22, %v562_v16  ;;  %vm568_vm11 = vcmp.eq.s32.totalorder %v1242_v22, %v566_v19 }
  0x71   : > { %v583_v25 = vsel %vm567_vm9, %v576_v21, 0.0  ;;  %v584_v30 = vsel %vm568_vm11, %v580_v23, 0.0  ;;  %vm569_vm13 = vcmp.eq.s32.totalorder %v1251_v29, %v562_v16  ;;  %vm570_vm15 = vcmp.eq.s32.totalorder %v1251_v29, %v566_v19 }
  0x72   : > { %vm596_vm10 = vcmp.eq.s32.totalorder %v1242_v22, %v591_v18  ;;  %vm597_vm12 = vcmp.eq.s32.totalorder %v1242_v22, %v595_v20  ;;  %vm598_vm14 = vcmp.eq.s32.totalorder %v1251_v29, %v591_v18  ;;  %vm599_vm0 = vcmp.eq.s32.totalorder %v1251_v29, %v595_v20 }
  0x73   : > { %v611_v28 = vsel %vm596_vm10, %v604_v17, 0.0  ;;  %v612_v31 = vsel %vm597_vm12, %v608_v24, 0.0  ;;  %v585_v26 = vsel %vm569_vm13, %v576_v21, 0.0  ;;  %v613_v33 = vsel %vm598_vm14, %v604_v17, 0.0 }
  0x74   : > { %v1364_v27 = vadd.f32 %v611_v28, %v583_v25  ;;  %v1366_v32 = vadd.f32 %v612_v31, %v584_v30  ;;  %v586_v34 = vsel %vm570_vm15, %v580_v23, 0.0  ;;  %v614_v22 = vsel %vm599_vm0, %v608_v24, 0.0 }
  0x75   : > { %v1370_v41 = vadd.f32 %v613_v33, %v585_v26  ;;  %v1374_v43 = vadd.f32 %v614_v22, %v586_v34 }
 0x126   : > { %v464_v35 = vpop.f32.mrb[0].mxu0  ;;  %v512_v36 = vpop.f32.mrb[0].mxu1 }
 0x127   : > { %v619_v37 = vmul.f32 %v1364_v27, %v464_v35  ;;  %v466_v38 = vpop.f32.mrb[1].mxu0  ;;  %v635_v39 = vmul.f32 %v1364_v27, %v512_v36  ;;  %v514_v40 = vpop.f32.mrb[1].mxu1 }
 0x128   : > { %v620_v29 = vmul.f32 %v1366_v32, %v466_v38  ;;  %v636_v42 = vmul.f32 %v1366_v32, %v514_v40 }
 0x12a   : > { %v470_v44 = vpop.f32.mrb[2].mxu0  ;;  %v518_v45 = vpop.f32.mrb[2].mxu1 }
 0x12b   : > { %v621_v46 = vmul.f32 %v1370_v41, %v470_v44  ;;  %v637_v47 = vmul.f32 %v1370_v41, %v518_v45  ;;  %v472_v48 = vpop.f32.mrb[3].mxu0  ;;  %v520_v49 = vpop.f32.mrb[3].mxu1 }
 0x12c   : > { %v622_v50 = vmul.f32 %v1374_v43, %v472_v48  ;;  %v638_v51 = vmul.f32 %v1374_v43, %v520_v49 }
 0x12d   : > { %v651_v52 = vadd.f32 %v621_v46, %v619_v37  ;;  %v707_v53 = vadd.f32 %v637_v47, %v635_v39 }
 0x12e   : > { %v658_v54 = vadd.f32 %v622_v50, %v620_v29  ;;  %v714_v55 = vadd.f32 %v638_v51, %v636_v42  ;;  %v476_v56 = vpop.f32.mrb[4].mxu0  ;;  %v524_v57 = vpop.f32.mrb[4].mxu1 }
 0x12f   : > { %v652_v58 = vrot.slane %v651_v52, 4  ;;  %v623_v59 = vmul.f32 %v1364_v27, %v476_v56  ;;  %v478_v60 = vpop.f32.mrb[5].mxu0  ;;  %v639_v61 = vmul.f32 %v1364_v27, %v524_v57  ;;  %v526_v62 = vpop.f32.mrb[5].mxu1  ;;  %v708_v11 = vrot.slane %v707_v53, 4 }
 0x130   : > { %v659_v63 = vrot.slane %v658_v54, 4  ;;  %v624_v1 = vmul.f32 %v1366_v32, %v478_v60  ;;  %v640_v2 = vmul.f32 %v1366_v32, %v526_v62  ;;  %v715_v17 = vrot.slane %v714_v55, 4 }
 0x131   : > { %v653_v3 = vadd.f32 %v652_v58, %v651_v52  ;;  %v709_v28 = vadd.f32 %v708_v11, %v707_v53 }
 0x132   : > { %v660_v4 = vadd.f32 %v659_v63, %v658_v54  ;;  %v482_v5 = vpop.f32.mrb[6].mxu0  ;;  %v530_v6 = vpop.f32.mrb[6].mxu1  ;;  %v1392_v36 = vadd.f32 %v715_v17, %v714_v55 }
 0x133   : > { %v625_v7 = vmul.f32 %v1370_v41, %v482_v5  ;;  %v641_v8 = vmul.f32 %v1370_v41, %v530_v6  ;;  %v484_v9 = vpop.f32.mrb[7].mxu0  ;;  %v532_v10 = vpop.f32.mrb[7].mxu1  ;;  %v654_v13 = vrot.slane %v653_v3, 2  ;;  %v710_v42 = vrot.slane %v709_v28, 2 }
 0x134   : > { %v626_v12 = vmul.f32 %v1374_v43, %v484_v9  ;;  %v642_v0 = vmul.f32 %v1374_v43, %v532_v10  ;;  %v661_v16 = vrot.slane %v660_v4, 2  ;;  %v717_v57 = vrot.slane %v1392_v36, 2 }
 0x135   : > { %v665_v14 = vadd.f32 %v625_v7, %v623_v59  ;;  %v1388_v15 = vadd.f32 %v641_v8, %v639_v61  ;;  %v655_v31 = vadd.f32 %v654_v13, %v653_v3  ;;  %v1403_v63 = vadd.f32 %v710_v42, %v709_v28 }
 0x136   : > { %v672_v18 = vadd.f32 %v626_v12, %v624_v1  ;;  %v1390_v19 = vadd.f32 %v642_v0, %v640_v2  ;;  %v488_v20 = vpop.f32.mrb[8].mxu0  ;;  %v536_v21 = vpop.f32.mrb[8].mxu1  ;;  %v662_v33 = vadd.f32 %v661_v16, %v660_v4 }
 0x137   : > { %v666_v23 = vrot.slane %v665_v14, 4  ;;  %v490_v24 = vpop.f32.mrb[9].mxu0  ;;  %v538_v25 = vpop.f32.mrb[9].mxu1  ;;  %v627_v38 = vmul.f32 %v1364_v27, %v488_v20  ;;  %v643_v45 = vmul.f32 %v1364_v27, %v536_v21  ;;  %v656_v47 = vrot.slane %v655_v31, 1 }
 0x138   : > { %v673_v30 = vrot.slane %v672_v18, 4  ;;  %v628_v39 = vmul.f32 %v1366_v32, %v490_v24  ;;  %v644_v46 = vmul.f32 %v1366_v32, %v538_v25  ;;  %v663_v51 = vrot.slane %v662_v33, 1 }
 0x139   : > { %v667_v26 = vadd.f32 %v666_v23, %v665_v14  ;;  %v657_v4 = vadd.f32 %v656_v47, %v655_v31  ;;  %v722_v6 = vrot.slane %v1388_v15, 4  ;;  %v729_v10 = vrot.slane %v1390_v19, 4 }
 0x13a   : > { %v674_v34 = vadd.f32 %v673_v30, %v672_v18  ;;  %v494_v22 = vpop.f32.mrb[10].mxu0  ;;  %v542_v35 = vpop.f32.mrb[10].mxu1  ;;  %v664_v8 = vadd.f32 %v663_v51, %v662_v33 }
 0x13b   : > { %v668_v37 = vrot.slane %v667_v26, 2  ;;  %v496_v40 = vpop.f32.mrb[11].mxu0  ;;  %v544_v29 = vpop.f32.mrb[11].mxu1  ;;  %v629_v49 = vmul.f32 %v1370_v41, %v494_v22  ;;  %v645_v50 = vmul.f32 %v1370_v41, %v542_v35  ;;  %v723_v28 = vadd.f32 %v722_v6, %v1388_v15 }
 0x13c   : > { %v675_v44 = vrot.slane %v674_v34, 2  ;;  %v630_v53 = vmul.f32 %v1374_v43, %v496_v40  ;;  %v646_v54 = vmul.f32 %v1374_v43, %v544_v29  ;;  %v730_v33 = vadd.f32 %v729_v10, %v1390_v19 }
 0x13d   : > { %v669_v48 = vadd.f32 %v668_v37, %v667_v26  ;;  %v679_v59 = vadd.f32 %v629_v49, %v627_v38  ;;  %v735_v60 = vadd.f32 %v645_v50, %v643_v45 }
 0x13e   : > { %v676_v52 = vadd.f32 %v675_v44, %v674_v34  ;;  %v500_v55 = vpop.f32.mrb[12].mxu0  ;;  %v548_v56 = vpop.f32.mrb[12].mxu1  ;;  %v686_v2 = vadd.f32 %v630_v53, %v628_v39  ;;  %v742_v3 = vadd.f32 %v646_v54, %v644_v46  ;;  %v731_v19 = vrot.slane %v730_v33, 2 }
 0x13f   : > { %v670_v58 = vrot.slane %v669_v48, 1  ;;  %v502_v61 = vpop.f32.mrb[13].mxu0  ;;  %v550_v62 = vpop.f32.mrb[13].mxu1  ;;  %v680_v7 = vrot.slane %v679_v59, 4  ;;  %v736_v16 = vrot.slane %v735_v60, 4  ;;  %v631_v18 = vmul.f32 %v1364_v27, %v500_v55 }
 0x140   : > { %v677_v1 = vrot.slane %v676_v52, 1  ;;  %v687_v11 = vrot.slane %v686_v2, 4  ;;  %v743_v24 = vrot.slane %v742_v3, 4  ;;  %v632_v25 = vmul.f32 %v1366_v32, %v502_v61 }
 0x141   : > { %v671_v5 = vadd.f32 %v670_v58, %v669_v48  ;;  %v681_v14 = vadd.f32 %v680_v7, %v679_v59  ;;  %v647_v31 = vmul.f32 %v1364_v27, %v548_v56  ;;  %v648_v26 = vmul.f32 %v1366_v32, %v550_v62 }
 0x142   : > { %v678_v9 = vadd.f32 %v677_v1, %v676_v52  ;;  %v506_v12 = vpop.f32.mrb[14].mxu0  ;;  %v554_v0 = vpop.f32.mrb[14].mxu1  ;;  %v688_v23 = vadd.f32 %v687_v11, %v686_v2  ;;  %v737_v38 = vadd.f32 %v736_v16, %v735_v60  ;;  %v744_v15 = vadd.f32 %v743_v24, %v742_v3 }
 0x143   : > { %v780_v13 = vsel %vm779_vm1, %v671_v5, %v657_v4  ;;  %v508_v20 = vpop.f32.mrb[15].mxu0  ;;  %v556_v21 = vpop.f32.mrb[15].mxu1  ;;  %v682_v30 = vrot.slane %v681_v14, 2  ;;  %v633_v22 = vmul.f32 %v1370_v41, %v506_v12  ;;  %v649_v35 = vmul.f32 %v1370_v41, %v554_v0 }
 0x144   : > { %v793_v17 = vsel %vm779_vm1, %v678_v9, %v664_v8  ;;  %v689_v34 = vrot.slane %v688_v23, 2  ;;  %v634_v39 = vmul.f32 %v1374_v43, %v508_v20  ;;  %v650_v40 = vmul.f32 %v1374_v43, %v556_v21 }
 0x145   : > { %v683_v37 = vadd.f32 %v682_v30, %v681_v14  ;;  %v693_v42 = vadd.f32 %v633_v22, %v631_v18  ;;  %v749_v44 = vadd.f32 %v649_v35, %v647_v31  ;;  %v724_v27 = vrot.slane %v723_v28, 2 }
 0x146   : > { %v690_v29 = vadd.f32 %v689_v34, %v688_v23  ;;  %v700_v32 = vadd.f32 %v634_v39, %v632_v25  ;;  %v756_v46 = vadd.f32 %v650_v40, %v648_v26  ;;  %v738_v41 = vrot.slane %v737_v38, 2 }
 0x147   : > { %v684_v45 = vrot.slane %v683_v37, 1  ;;  %v694_v48 = vrot.slane %v693_v42, 4  ;;  %v750_v49 = vrot.slane %v749_v44, 4  ;;  %v745_v54 = vrot.slane %v744_v15, 2 }
 0x148   : > { %v691_v47 = vrot.slane %v690_v29, 1  ;;  %v701_v51 = vrot.slane %v700_v32, 4  ;;  %v757_v52 = vrot.slane %v756_v46, 4  ;;  %v718_v56 = vadd.f32 %v717_v57, %v1392_v36 }
 0x149   : > { %v685_v50 = vadd.f32 %v684_v45, %v683_v37  ;;  %v695_v43 = vadd.f32 %v694_v48, %v693_v42  ;;  %v751_v55 = vadd.f32 %v750_v49, %v749_v44  ;;  %v725_v61 = vadd.f32 %v724_v27, %v723_v28 }
 0x14a   : > { %v692_v53 = vadd.f32 %v691_v47, %v690_v29  ;;  %v702_v59 = vadd.f32 %v701_v51, %v700_v32  ;;  %v758_v60 = vadd.f32 %v757_v52, %v756_v46  ;;  %v732_v3 = vadd.f32 %v731_v19, %v730_v33 }
 0x14b   : > { %v782_v58 = vsel %vm781_vm2, %v685_v50, %v780_v13  ;;  %v696_v1 = vrot.slane %v695_v43, 2  ;;  %v752_v2 = vrot.slane %v751_v55, 2  ;;  %v739_v4 = vadd.f32 %v738_v41, %v737_v38 }
 0x14c   : > { %v794_v62 = vsel %vm781_vm2, %v692_v53, %v793_v17  ;;  %v703_v5 = vrot.slane %v702_v59, 2  ;;  %v759_v6 = vrot.slane %v758_v60, 2  ;;  %v746_v7 = vadd.f32 %v745_v54, %v744_v15 }
 0x14d   : > { %v697_v8 = vadd.f32 %v696_v1, %v695_v43  ;;  %v753_v9 = vadd.f32 %v752_v2, %v751_v55  ;;  %v712_v36 = vrot.slane %v1403_v63, 1  ;;  %v719_v11 = vrot.slane %v718_v56, 1 }
 0x14e   : > { %v704_v57 = vadd.f32 %v703_v5, %v702_v59  ;;  %v760_v10 = vadd.f32 %v759_v6, %v758_v60  ;;  %v726_v12 = vrot.slane %v725_v61, 1  ;;  %v733_v13 = vrot.slane %v732_v3, 1 }
 0x14f   : > { %v698_v0 = vrot.slane %v697_v8, 1  ;;  %v740_v14 = vrot.slane %v739_v4, 1  ;;  %v747_v18 = vrot.slane %v746_v7, 1  ;;  %v754_v21 = vrot.slane %v753_v9, 1 }
 0x150   : > { %v705_v16 = vrot.slane %v704_v57, 1  ;;  %v713_v17 = vadd.f32 %v712_v36, %v1403_v63  ;;  %v761_v24 = vrot.slane %v760_v10, 1  ;;  %v720_v25 = vadd.f32 %v719_v11, %v718_v56 }
 0x151   : > { %v699_v20 = vadd.f32 %v698_v0, %v697_v8  ;;  %v727_v28 = vadd.f32 %v726_v12, %v725_v61  ;;  %v734_v31 = vadd.f32 %v733_v13, %v732_v3  ;;  %v741_v26 = vadd.f32 %v740_v14, %v739_v4 }
 0x152   : > { %v706_v23 = vadd.f32 %v705_v16, %v704_v57  ;;  %v748_v22 = vadd.f32 %v747_v18, %v746_v7  ;;  %v755_v63 = vadd.f32 %v754_v21, %v753_v9  ;;  %v762_v38 = vadd.f32 %v761_v24, %v760_v10 }
 0x153   : > { %v784_v30 = vsel %vm783_vm3, %v699_v20, %v782_v58 }
 0x154   : > { %v795_v33 = vsel %vm783_vm3, %v706_v23, %v794_v62  ;;  %v786_v34 = vsel %vm785_vm4, %v713_v17, %v784_v30 }
 0x155   : > { %v788_v35 = vsel %vm787_vm5, %v727_v28, %v786_v34  ;;  %v796_v37 = vsel %vm785_vm4, %v720_v25, %v795_v33 }
 0x156   : > { %v790_v39 = vsel %vm789_vm6, %v741_v26, %v788_v35  ;;  %v797_v40 = vsel %vm787_vm5, %v734_v31, %v796_v37 }
 0x157   : > { %v792_v29 = vsel %vm791_vm7, %v755_v63, %v790_v39  ;;  %v798_v15 = vsel %vm789_vm6, %v748_v22, %v797_v40 }
 0x158   : > { %v799_v42 = vsel %vm791_vm7, %v762_v38, %v798_v15  ;;  %802 = vst [vmem:[%s221_s22] sm:$0xff] %v792_v29 }
 0x159   : > { %803 = vst [vmem:[%s221_s22 + $0x8] sm:$0xff] %v799_v42 }
 0x15a   : > { %1046 = shalt.err (!%p1043_p2)
}
 0x15b   : > { %s1047_s9 = scalar_lea.hbm %s1442_s29, 256  ;;  %s1051_s12 = scalar_lea.hbm %s1496_s4, 2304 }
 0x15c   : > { %p1048_p3 = scmp.ne.s32.totalorder %s1442_s29, %s1047_s9  ;;  %p1052_p7 = scmp.lt.u32.totalorder %s1442_s29, %s1496_s4 }
 0x15d   : > { %p1053_p9 = scmp.lt.u32.totalorder %s1051_s12, %s1047_s9  ;;  %p1055_p11 = scmp.lt.u32.totalorder %s1047_s9, %s1442_s29 }
 0x15e   : > { %p1049_p5 = pnand %p1048_p3, %p1187_p4 }
 0x15f   : > { %p1054_p10 = por %p1053_p9, %p1052_p7 }
 0x160   : > { %p1050_p6 = pneg %p1049_p5 }
 0x161   : > { %p1056_p12 = por %p1055_p11, %p1054_p10 }
 0x163   : > { %p1057_p13 = pnand %p1056_p12, %p1050_p6 }
 0x165   : > { %1060 = shalt.err (!%p1057_p13)
}
 0x166   : > { %953 = dma.vmem_to_hbm [thread:$0]  (%p1187_p4), %s1444_s24, 256, %s1442_s29, %s805_s5  }
 0x167 PF: > { %p965_p0 = scmp.ge.s32.totalorder %s1115_s20, 2  ;;  %s833_s21 = sand.u32 1, %s1095_s15  }
 0x168   : > { %s834_s22 = scalar_lea.sflag [#allocation3], %s833_s21 }
 0x169   : > { %p960_p1 = pnand %p965_p0, %p1194_p8 }
 0x16b   : > { %1090 = dma.done.wait (!%p960_p1), %s834_s22, 256  }
 0x16c   : > { %1092 = vsyncadd (!%p960_p1), %s834_s22, 4294967040  ;;  %s18_s20 = sadd.s32 1, %s1115_s20   ;;  %s1502_s15 = smov %s1099_s16 }
 0x16d   : > { %p15_p2 = scmp.ge.s32.totalorder %s18_s20, 11   ;;  %s1503_s16 = smov %s1103_s17 }
 0x16e   : > { %s1504_s17 = smov %s1200_s28  ;;  %s1505_s18 = smov %s1111_s19 }
 0x16f   : > { %s1506_s19 = smov %s1508_s23  ;;  %17 = sbr.rel (!%p15_p2) target bundleno = 5 (0x5), region = 76 }
 0x176   :  { %839 = vsyncpa [#allocation3], 1 }
 0x177   :  { %841 = vsyncpa [#allocation3 + $0x1], 1 }
 0x178   :  { %842 = vsyncpa [#allocation4], 1 }
 0x179   :  { %844 = vsyncpa [#allocation4 + $0x1], 1 }

</bundles_post_ra>
